<compile_context>
chip_gen: v7x
topology: tpu7x:2x2x1
jax: 0.10.0
libtpu: 0.0.40
codegen_flags: <defaults>
</compile_context>

<pallas_src>
import functools

import jax
import jax.numpy as jnp
from jax.experimental import pallas as pl
from jax.experimental.pallas import tpu as pltpu

EPS = 1e-6  # PyTorch PairwiseDistance default eps (added to the difference)


def _hardloss_kernel(batch, tile_b, tiles_per_core,
                     dc_ref, a_ref, s_ref, p_ref, n_ref, out_ref, acc_ref):
    """Grid = (core, row_tile). Accumulates per-core partial sums in SMEM."""
    c = pl.program_id(0)   # core axis (CORE_PARALLEL on v7x, size-1 otherwise)
    j = pl.program_id(1)   # "arbitrary" reduction axis over row tiles

    @pl.when(j == 0)
    def _init():
        acc_ref[0] = jnp.float32(0.0)   # sum of (dc_k - d_k)^2 terms
        acc_ref[1] = jnp.float32(0.0)   # sum of triplet relu terms

    # Logical (unclamped) tile index; rows >= batch are masked, which also
    # neutralizes any clamped duplicate tile on the 2-core path.
    tile_idx = c * tiles_per_core + j
    rows = tile_idx * tile_b + jax.lax.broadcasted_iota(jnp.int32, (tile_b, 1), 0)
    valid = rows < batch

    # Hoisted scalar reads of the three centers (SMEM).
    dc0 = dc_ref[0]
    dc1 = dc_ref[1]
    dc2 = dc_ref[2]

    a = a_ref[...].astype(jnp.float32)

    def dist(ref):
        # ||a - x + eps||_2 along the feature axis, kept 2-D as (tile_b, 1)
        diff = a - ref[...].astype(jnp.float32) + EPS
        return jnp.sqrt(jnp.sum(diff * diff, axis=-1, keepdims=True))

    d_as = dist(s_ref)   # dis(a, s)
    d_ap = dist(p_ref)   # dis(a, p)
    d_an = dist(n_ref)   # dis(a, n)

    c_terms = ((dc0 - d_as) ** 2 +
               (dc1 - d_ap) ** 2 +
               (dc2 - d_an) ** 2)
    t_terms = (jnp.maximum(d_as - d_ap, 0.0) +            # margin 0
               jnp.maximum(d_ap - d_an + 3.0, 0.0))        # margin 3

    # Select (not multiply-mask): padding rows may hold inf/NaN garbage from
    # the out-of-bounds DMA; a select keeps them out of the accumulator.
    zero = jnp.zeros_like(c_terms)
    acc_ref[0] += jnp.sum(jnp.where(valid, c_terms, zero))
    acc_ref[1] += jnp.sum(jnp.where(valid, t_terms, zero))

    @pl.when(j == pl.num_programs(1) - 1)
    def _finalize():
        # Lane-dense (1, 8, 128) per-core partial block:
        #   [0, 0, 0] = sum of center SE terms, [0, 0, 1] = sum of relu terms.
        sub = jax.lax.broadcasted_iota(jnp.int32, (1, 8, 128), 1)
        lane = jax.lax.broadcasted_iota(jnp.int32, (1, 8, 128), 2)
        first_row = sub == 0
        out_ref[...] = jnp.where(
            first_row & (lane == 0), acc_ref[0],
            jnp.where(first_row & (lane == 1), acc_ref[1], jnp.float32(0.0)))


def _num_tensorcores():
    """2 on v7x (2 TCs/chip), 1 on v5e/v6e. Conservative fallback = 1."""
    try:
        kind = jax.devices()[0].device_kind.lower()
    except Exception:
        return 1
    return 2 if ("v7" in kind or "7x" in kind) else 1


def _vmem_capacity_bytes():
    try:
        cap = getattr(pltpu.get_tpu_info(), "vmem_capacity_bytes", None)
        if cap:
            return int(cap)
    except Exception:
        pass
    return 64 * 1024 * 1024   # conservative (v7x physical per-TC)


def final_hardloss_forward(outputs, lb=None, *, tile_b=None):
    """Mirrors final_hardloss.forward(outputs, lb). `lb` is unused (as in torch)."""
    del lb  # unused, as in the PyTorch module
    a, s, p, n = outputs[1], outputs[2], outputs[3], outputs[4]
    dis_center = outputs[5]

    B, D = a.shape
    itemsize = jnp.dtype(a.dtype).itemsize
    sub = max(8, 32 // itemsize)          # dtype-native sublane: 8 f32 / 16 bf16 / 32 int8

    # --- generation-aware VMEM budget for the 4-input double-buffered tiles ---
    vmem_cap = _vmem_capacity_bytes()
    budget = min(24 * 1024 * 1024, (vmem_cap * 3) // 8)
    row_bytes = 4 * 2 * D * itemsize      # 4 inputs x 2 pipeline buffers per row

    if tile_b is None:
        tile_b = max(sub, min(8192, budget // max(row_bytes, 1)))
    tile_b = max(sub, (tile_b // sub) * sub)            # sublane-aligned per dtype
    tile_b = min(tile_b, pl.cdiv(B, sub) * sub)         # don't exceed (padded) batch

    num_cores = _num_tensorcores()
    num_tiles = pl.cdiv(B, tile_b)

    # On the 2-core path, prefer an even tile count over a clamped duplicate
    # DMA (the mask keeps either variant correct; even is just cheaper).
    if num_cores == 2 and num_tiles > 1 and num_tiles % 2 == 1:
        cand = tile_b - sub
        while cand >= sub:
            if pl.cdiv(B, cand) % 2 == 0:
                tile_b = cand
                num_tiles = pl.cdiv(B, cand)
                break
            cand -= sub

    tiles_per_core = pl.cdiv(num_tiles, num_cores)

    def row_map(c, j, dc):                # dc = scalar-prefetch ref (unused)
        t = c * tiles_per_core + j
        return (jnp.minimum(t, num_tiles - 1), 0)   # clamp keeps DMA in-bounds

    kernel = functools.partial(_hardloss_kernel, B, tile_b, tiles_per_core)

    if num_cores == 2:
        dim_sems = (pltpu.CORE_PARALLEL, pltpu.ARBITRARY)   # force real TC split
    else:
        dim_sems = (pltpu.ARBITRARY, pltpu.ARBITRARY)       # plain serial reduction

    vmem_limit = int(min(vmem_cap, budget + 8 * 1024 * 1024))

    cost = pl.CostEstimate(
        flops=12 * B * D,
        transcendentals=3 * B,
        bytes_accessed=4 * B * D * itemsize + 3 * 4 + num_cores * 8 * 128 * 4,
    )

    partials = pl.pallas_call(
        kernel,
        out_shape=jax.ShapeDtypeStruct((num_cores, 8, 128), jnp.float32),
        grid_spec=pltpu.PrefetchScalarGridSpec(
            num_scalar_prefetch=1,               # dis_center -> SMEM
            grid=(num_cores, tiles_per_core),
            in_specs=[
                pl.BlockSpec((tile_b, D), row_map),   # a
                pl.BlockSpec((tile_b, D), row_map),   # s
                pl.BlockSpec((tile_b, D), row_map),   # p
                pl.BlockSpec((tile_b, D), row_map),   # n
            ],
            out_specs=pl.BlockSpec((1, 8, 128), lambda c, j, dc: (c, 0, 0)),
            scratch_shapes=[pltpu.SMEM((2,), jnp.float32)],
        ),
        compiler_params=pltpu.CompilerParams(
            dimension_semantics=dim_sems,
            vmem_limit_bytes=vmem_limit),
        cost_estimate=cost,
    )(dis_center.astype(jnp.float32), a, s, p, n)

    psum = jnp.sum(partials[:, 0, :2], axis=0)   # sum per-core partials
    inv_b = jnp.float32(1.0 / B)
    c_loss = psum[0] * inv_b
    trip_loss = psum[1] * inv_b
    loss = c_loss + trip_loss
    return loss, (c_loss, trip_loss)


def _ref_loss(a, s, p, n, dc):
    """Pure-JAX reference (same math as the PyTorch module)."""
    af, sf, pf, nf = (x.astype(jnp.float32) for x in (a, s, p, n))
    dcf = dc.astype(jnp.float32)

    def _dis(x, y):
        return jnp.sqrt(jnp.sum((x - y + EPS) ** 2, axis=-1))

    d_as, d_ap, d_an = _dis(af, sf), _dis(af, pf), _dis(af, nf)
    c = (jnp.mean((dcf[0] - d_as) ** 2) + jnp.mean((dcf[1] - d_ap) ** 2)
         + jnp.mean((dcf[2] - d_an) ** 2))
    t = (jnp.mean(jnp.maximum(d_as - d_ap, 0.0))
         + jnp.mean(jnp.maximum(d_ap - d_an + 3.0, 0.0)))
    return c, t


if __name__ == "__main__":
    # ---- primary test: small f32 problem ------------------------------------
    B, D = 8, 32
    key = jax.random.PRNGKey(0)
    k0, k1, k2, k3, k4, k5, k6 = jax.random.split(key, 7)

    dummy_logits = jax.random.normal(k0, (B, 4), jnp.float32)   # outputs[0], unused
    a = jax.random.normal(k1, (B, D), jnp.float32)
    s = jax.random.normal(k2, (B, D), jnp.float32)
    p = jax.random.normal(k3, (B, D), jnp.float32)
    n = jax.random.normal(k4, (B, D), jnp.float32)
    dis_center = jax.random.uniform(k5, (3,), jnp.float32) * 5.0
    lb = jnp.zeros((B,), jnp.int32)                              # unused, as in torch

    outputs = (dummy_logits, a, s, p, n, dis_center)
    loss, (c_loss, trip_loss) = final_hardloss_forward(outputs, lb)
    jax.block_until_ready((loss, c_loss, trip_loss))

    c_ref, t_ref = _ref_loss(a, s, p, n, dis_center)
    assert jnp.allclose(c_loss, c_ref, rtol=1e-5, atol=1e-5)
    assert jnp.allclose(trip_loss, t_ref, rtol=1e-5, atol=1e-5)
    assert jnp.allclose(loss, c_ref + t_ref, rtol=1e-5, atol=1e-5)

    # ---- secondary test: bf16 inputs, multi-tile grid + masked ragged tile ---
    B2, D2 = 300, 256
    j1, j2, j3, j4, j5 = jax.random.split(k6, 5)
    a2 = jax.random.normal(j1, (B2, D2), jnp.float32).astype(jnp.bfloat16)
    s2 = jax.random.normal(j2, (B2, D2), jnp.float32).astype(jnp.bfloat16)
    p2 = jax.random.normal(j3, (B2, D2), jnp.float32).astype(jnp.bfloat16)
    n2 = jax.random.normal(j4, (B2, D2), jnp.float32).astype(jnp.bfloat16)
    dc2 = jax.random.uniform(j5, (3,), jnp.float32) * 5.0
    lb2 = jnp.zeros((B2,), jnp.int32)

    outputs2 = (None, a2, s2, p2, n2, dc2)
    loss2, (c2, t2) = final_hardloss_forward(outputs2, lb2, tile_b=64)
    jax.block_until_ready((loss2, c2, t2))

    c2_ref, t2_ref = _ref_loss(a2, s2, p2, n2, dc2)
    assert jnp.allclose(c2, c2_ref, rtol=1e-4, atol=1e-3)
    assert jnp.allclose(t2, t2_ref, rtol=1e-4, atol=1e-3)
    assert jnp.allclose(loss2, c2_ref + t2_ref, rtol=1e-4, atol=1e-3)

    # ---- tertiary test: auto tile sizing (big budget path), f32 --------------
    B3, D3 = 130, 64
    m1, m2, m3, m4, m5 = jax.random.split(jax.random.PRNGKey(7), 5)
    a3 = jax.random.normal(m1, (B3, D3), jnp.float32)
    s3 = jax.random.normal(m2, (B3, D3), jnp.float32)
    p3 = jax.random.normal(m3, (B3, D3), jnp.float32)
    n3 = jax.random.normal(m4, (B3, D3), jnp.float32)
    dc3 = jax.random.uniform(m5, (3,), jnp.float32) * 5.0

    loss3, (c3, t3) = final_hardloss_forward((None, a3, s3, p3, n3, dc3), None)
    jax.block_until_ready((loss3, c3, t3))
    c3_ref, t3_ref = _ref_loss(a3, s3, p3, n3, dc3)
    assert jnp.allclose(c3, c3_ref, rtol=1e-5, atol=1e-5)
    assert jnp.allclose(t3, t3_ref, rtol=1e-5, atol=1e-5)

    print("KERNEL_OK")
</pallas_src>

<mosaic_0001>
module attributes {stable_mosaic.version = 11 : i64} {
  func.func @_hardloss_kernel(%arg0: i32, %arg1: i32, %arg2: memref<3xf32, #tpu.memory_space<smem>>, %arg3: memref<8x32xf32, #tpu.memory_space<vmem>>, %arg4: memref<8x32xf32, #tpu.memory_space<vmem>>, %arg5: memref<8x32xf32, #tpu.memory_space<vmem>>, %arg6: memref<8x32xf32, #tpu.memory_space<vmem>>, %arg7: memref<1x8x128xf32, #tpu.memory_space<vmem>>, %arg8: memref<2xf32, #tpu.memory_space<smem>>) attributes {dimension_semantics = [#tpu.dimension_semantics<arbitrary>, #tpu.dimension_semantics<arbitrary>], iteration_bounds = array<i64: 1, 1>, scalar_prefetch = 1 : i64, scratch_operands = 1 : i64, tpu.core_type = #tpu.core_type<tc>, window_params = [{transform_indices = @transform_0, window_bounds = array<i64: 8, 32>}, {transform_indices = @transform_1, window_bounds = array<i64: 8, 32>}, {transform_indices = @transform_2, window_bounds = array<i64: 8, 32>}, {transform_indices = @transform_3, window_bounds = array<i64: 8, 32>}, {transform_indices = @transform_4, window_bounds = array<i64: 1, 8, 128>}]} {
    %c0_i32 = arith.constant 0 : i32
    %0 = arith.cmpi eq, %arg1, %c0_i32 : i32
    %1 = arith.extui %0 : i1 to i32
    %c0_i32_0 = arith.constant 0 : i32
    %2 = arith.cmpi ne, %1, %c0_i32_0 : i32
    scf.if %2 {
      %cst_27 = arith.constant 0.000000e+00 : f32
      %c0_28 = arith.constant 0 : index
      %79 = memref.load %arg8[%c0_28] : memref<2xf32, #tpu.memory_space<smem>>
      memref.store %cst_27, %arg8[%c0_28] : memref<2xf32, #tpu.memory_space<smem>>
      %cst_29 = arith.constant 0.000000e+00 : f32
      %c1_30 = arith.constant 1 : index
      %80 = memref.load %arg8[%c1_30] : memref<2xf32, #tpu.memory_space<smem>>
      memref.store %cst_29, %arg8[%c1_30] : memref<2xf32, #tpu.memory_space<smem>>
    } else {
    }
    %c1_i32 = arith.constant 1 : i32
    %3 = arith.muli %arg0, %c1_i32 : i32
    %4 = arith.addi %3, %arg1 : i32
    %c8_i32 = arith.constant 8 : i32
    %5 = arith.muli %4, %c8_i32 : i32
    %6 = tpu.iota {dimensions = array<i32: 0>} : vector<8x1xi32>
    %7 = vector.broadcast %5 : i32 to vector<8x1xi32>
    %8 = arith.addi %7, %6 : vector<8x1xi32>
    %c8_i32_1 = arith.constant 8 : i32
    %9 = vector.broadcast %c8_i32_1 : i32 to vector<8x1xi32>
    %10 = arith.cmpi slt, %8, %9 : vector<8x1xi32>
    %c0 = arith.constant 0 : index
    %11 = memref.load %arg2[%c0] : memref<3xf32, #tpu.memory_space<smem>>
    %c1 = arith.constant 1 : index
    %12 = memref.load %arg2[%c1] : memref<3xf32, #tpu.memory_space<smem>>
    %c2 = arith.constant 2 : index
    %13 = memref.load %arg2[%c2] : memref<3xf32, #tpu.memory_space<smem>>
    %c0_2 = arith.constant 0 : index
    %c0_3 = arith.constant 0 : index
    %14 = vector.load %arg3[%c0_2, %c0_3] : memref<8x32xf32, #tpu.memory_space<vmem>>, vector<8x32xf32>
    %c0_4 = arith.constant 0 : index
    %c0_5 = arith.constant 0 : index
    %15 = vector.load %arg4[%c0_4, %c0_5] : memref<8x32xf32, #tpu.memory_space<vmem>>, vector<8x32xf32>
    %16 = arith.subf %14, %15 : vector<8x32xf32>
    %cst = arith.constant 9.99999997E-7 : f32
    %17 = vector.broadcast %cst : f32 to vector<8x32xf32>
    %18 = arith.addf %16, %17 : vector<8x32xf32>
    %19 = arith.mulf %18, %18 : vector<8x32xf32>
    %cst_6 = arith.constant dense<0.000000e+00> : vector<8xf32>
    %20 = vector.multi_reduction <add>, %19, %cst_6 [1] : vector<8x32xf32> to vector<8xf32>
    %21 = vector.shape_cast %20 : vector<8xf32> to vector<8x1xf32>
    %22 = math.sqrt %21 : vector<8x1xf32>
    %c0_7 = arith.constant 0 : index
    %c0_8 = arith.constant 0 : index
    %23 = vector.load %arg5[%c0_7, %c0_8] : memref<8x32xf32, #tpu.memory_space<vmem>>, vector<8x32xf32>
    %24 = arith.subf %14, %23 : vector<8x32xf32>
    %cst_9 = arith.constant 9.99999997E-7 : f32
    %25 = vector.broadcast %cst_9 : f32 to vector<8x32xf32>
    %26 = arith.addf %24, %25 : vector<8x32xf32>
    %27 = arith.mulf %26, %26 : vector<8x32xf32>
    %cst_10 = arith.constant dense<0.000000e+00> : vector<8xf32>
    %28 = vector.multi_reduction <add>, %27, %cst_10 [1] : vector<8x32xf32> to vector<8xf32>
    %29 = vector.shape_cast %28 : vector<8xf32> to vector<8x1xf32>
    %30 = math.sqrt %29 : vector<8x1xf32>
    %c0_11 = arith.constant 0 : index
    %c0_12 = arith.constant 0 : index
    %31 = vector.load %arg6[%c0_11, %c0_12] : memref<8x32xf32, #tpu.memory_space<vmem>>, vector<8x32xf32>
    %32 = arith.subf %14, %31 : vector<8x32xf32>
    %cst_13 = arith.constant 9.99999997E-7 : f32
    %33 = vector.broadcast %cst_13 : f32 to vector<8x32xf32>
    %34 = arith.addf %32, %33 : vector<8x32xf32>
    %35 = arith.mulf %34, %34 : vector<8x32xf32>
    %cst_14 = arith.constant dense<0.000000e+00> : vector<8xf32>
    %36 = vector.multi_reduction <add>, %35, %cst_14 [1] : vector<8x32xf32> to vector<8xf32>
    %37 = vector.shape_cast %36 : vector<8xf32> to vector<8x1xf32>
    %38 = math.sqrt %37 : vector<8x1xf32>
    %39 = vector.broadcast %11 : f32 to vector<8x1xf32>
    %40 = arith.subf %39, %22 : vector<8x1xf32>
    %41 = arith.mulf %40, %40 : vector<8x1xf32>
    %42 = vector.broadcast %12 : f32 to vector<8x1xf32>
    %43 = arith.subf %42, %30 : vector<8x1xf32>
    %44 = arith.mulf %43, %43 : vector<8x1xf32>
    %45 = arith.addf %41, %44 : vector<8x1xf32>
    %46 = vector.broadcast %13 : f32 to vector<8x1xf32>
    %47 = arith.subf %46, %38 : vector<8x1xf32>
    %48 = arith.mulf %47, %47 : vector<8x1xf32>
    %49 = arith.addf %45, %48 : vector<8x1xf32>
    %50 = arith.subf %22, %30 : vector<8x1xf32>
    %cst_15 = arith.constant 0.000000e+00 : f32
    %51 = vector.broadcast %cst_15 : f32 to vector<8x1xf32>
    %52 = arith.maximumf %50, %51 : vector<8x1xf32>
    %53 = arith.subf %30, %38 : vector<8x1xf32>
    %cst_16 = arith.constant 3.000000e+00 : f32
    %54 = vector.broadcast %cst_16 : f32 to vector<8x1xf32>
    %55 = arith.addf %53, %54 : vector<8x1xf32>
    %cst_17 = arith.constant 0.000000e+00 : f32
    %56 = vector.broadcast %cst_17 : f32 to vector<8x1xf32>
    %57 = arith.maximumf %55, %56 : vector<8x1xf32>
    %58 = arith.addf %52, %57 : vector<8x1xf32>
    %cst_18 = arith.constant 0.000000e+00 : f32
    %59 = vector.broadcast %cst_18 : f32 to vector<8x1xf32>
    %c0_19 = arith.constant 0 : index
    %60 = memref.load %arg8[%c0_19] : memref<2xf32, #tpu.memory_space<smem>>
    %61 = arith.select %10, %49, %59 : vector<8x1xi1>, vector<8x1xf32>
    %62 = vector.shape_cast %61 : vector<8x1xf32> to vector<1x8x1xf32>
    %cst_20 = arith.constant dense<0.000000e+00> : vector<1xf32>
    %63 = vector.multi_reduction <add>, %62, %cst_20 [1, 2] : vector<1x8x1xf32> to vector<1xf32>
    %64 = vector.shape_cast %63 : vector<1xf32> to vector<1x1x1xf32>
    %65 = vector.extract %64[0, 0, 0] : f32 from vector<1x1x1xf32>
    %66 = arith.addf %60, %65 : f32
    %c0_21 = arith.constant 0 : index
    %67 = memref.load %arg8[%c0_21] : memref<2xf32, #tpu.memory_space<smem>>
    memref.store %66, %arg8[%c0_21] : memref<2xf32, #tpu.memory_space<smem>>
    %c1_22 = arith.constant 1 : index
    %68 = memref.load %arg8[%c1_22] : memref<2xf32, #tpu.memory_space<smem>>
    %69 = arith.select %10, %58, %59 : vector<8x1xi1>, vector<8x1xf32>
    %70 = vector.shape_cast %69 : vector<8x1xf32> to vector<1x8x1xf32>
    %cst_23 = arith.constant dense<0.000000e+00> : vector<1xf32>
    %71 = vector.multi_reduction <add>, %70, %cst_23 [1, 2] : vector<1x8x1xf32> to vector<1xf32>
    %72 = vector.shape_cast %71 : vector<1xf32> to vector<1x1x1xf32>
    %73 = vector.extract %72[0, 0, 0] : f32 from vector<1x1x1xf32>
    %74 = arith.addf %68, %73 : f32
    %c1_24 = arith.constant 1 : index
    %75 = memref.load %arg8[%c1_24] : memref<2xf32, #tpu.memory_space<smem>>
    memref.store %74, %arg8[%c1_24] : memref<2xf32, #tpu.memory_space<smem>>
    %c0_i32_25 = arith.constant 0 : i32
    %76 = arith.cmpi eq, %arg1, %c0_i32_25 : i32
    %77 = arith.extui %76 : i1 to i32
    %c0_i32_26 = arith.constant 0 : i32
    %78 = arith.cmpi ne, %77, %c0_i32_26 : i32
    scf.if %78 {
      %79 = tpu.iota {dimensions = array<i32: 1>} : vector<1x8x128xi32>
      %80 = tpu.iota {dimensions = array<i32: 2>} : vector<1x8x128xi32>
      %c0_i32_27 = arith.constant 0 : i32
      %81 = vector.broadcast %c0_i32_27 : i32 to vector<1x8x128xi32>
      %82 = arith.cmpi eq, %79, %81 : vector<1x8x128xi32>
      %c0_i32_28 = arith.constant 0 : i32
      %83 = vector.broadcast %c0_i32_28 : i32 to vector<1x8x128xi32>
      %84 = arith.cmpi eq, %80, %83 : vector<1x8x128xi32>
      %85 = arith.andi %82, %84 : vector<1x8x128xi1>
      %c0_29 = arith.constant 0 : index
      %86 = memref.load %arg8[%c0_29] : memref<2xf32, #tpu.memory_space<smem>>
      %c1_i32_30 = arith.constant 1 : i32
      %87 = vector.broadcast %c1_i32_30 : i32 to vector<1x8x128xi32>
      %88 = arith.cmpi eq, %80, %87 : vector<1x8x128xi32>
      %89 = arith.andi %82, %88 : vector<1x8x128xi1>
      %c1_31 = arith.constant 1 : index
      %90 = memref.load %arg8[%c1_31] : memref<2xf32, #tpu.memory_space<smem>>
      %cst_32 = arith.constant 0.000000e+00 : f32
      %91 = vector.broadcast %90 : f32 to vector<1x8x128xf32>
      %92 = vector.broadcast %cst_32 : f32 to vector<1x8x128xf32>
      %93 = arith.select %89, %91, %92 : vector<1x8x128xi1>, vector<1x8x128xf32>
      %94 = vector.broadcast %86 : f32 to vector<1x8x128xf32>
      %95 = arith.select %85, %94, %93 : vector<1x8x128xi1>, vector<1x8x128xf32>
      %c0_33 = arith.constant 0 : index
      %c0_34 = arith.constant 0 : index
      %c0_35 = arith.constant 0 : index
      %96 = vector.load %arg7[%c0_33, %c0_34, %c0_35] : memref<1x8x128xf32, #tpu.memory_space<vmem>>, vector<1x8x128xf32>
      tpu.vector_store %arg7[%c0_33, %c0_34, %c0_35], %95 {strides = array<i32>} : memref<1x8x128xf32, #tpu.memory_space<vmem>>, vector<1x8x128xf32>,
    } else {
    }
    return
  }
  func.func @transform_0(%arg0: i32, %arg1: i32, %arg2: memref<3xf32, #tpu.memory_space<smem>>) -> (i32, i32) {
    %c1_i32 = arith.constant 1 : i32
    %0 = arith.muli %arg0, %c1_i32 : i32
    %1 = arith.addi %0, %arg1 : i32
    %c0_i32 = arith.constant 0 : i32
    %2 = arith.minsi %1, %c0_i32 : i32
    %c0_i32_0 = arith.constant 0 : i32
    %c0_i32_1 = arith.constant 0 : i32
    return %2, %c0_i32_0 : i32, i32
  }
  func.func @transform_1(%arg0: i32, %arg1: i32, %arg2: memref<3xf32, #tpu.memory_space<smem>>) -> (i32, i32) {
    %c1_i32 = arith.constant 1 : i32
    %0 = arith.muli %arg0, %c1_i32 : i32
    %1 = arith.addi %0, %arg1 : i32
    %c0_i32 = arith.constant 0 : i32
    %2 = arith.minsi %1, %c0_i32 : i32
    %c0_i32_0 = arith.constant 0 : i32
    %c0_i32_1 = arith.constant 0 : i32
    return %2, %c0_i32_0 : i32, i32
  }
  func.func @transform_2(%arg0: i32, %arg1: i32, %arg2: memref<3xf32, #tpu.memory_space<smem>>) -> (i32, i32) {
    %c1_i32 = arith.constant 1 : i32
    %0 = arith.muli %arg0, %c1_i32 : i32
    %1 = arith.addi %0, %arg1 : i32
    %c0_i32 = arith.constant 0 : i32
    %2 = arith.minsi %1, %c0_i32 : i32
    %c0_i32_0 = arith.constant 0 : i32
    %c0_i32_1 = arith.constant 0 : i32
    return %2, %c0_i32_0 : i32, i32
  }
  func.func @transform_3(%arg0: i32, %arg1: i32, %arg2: memref<3xf32, #tpu.memory_space<smem>>) -> (i32, i32) {
    %c1_i32 = arith.constant 1 : i32
    %0 = arith.muli %arg0, %c1_i32 : i32
    %1 = arith.addi %0, %arg1 : i32
    %c0_i32 = arith.constant 0 : i32
    %2 = arith.minsi %1, %c0_i32 : i32
    %c0_i32_0 = arith.constant 0 : i32
    %c0_i32_1 = arith.constant 0 : i32
    return %2, %c0_i32_0 : i32, i32
  }
  func.func @transform_4(%arg0: i32, %arg1: i32, %arg2: memref<3xf32, #tpu.memory_space<smem>>) -> (i32, i32, i32) {
    %c0_i32 = arith.constant 0 : i32
    %c0_i32_0 = arith.constant 0 : i32
    %c0_i32_1 = arith.constant 0 : i32
    return %arg0, %c0_i32, %c0_i32_0 : i32, i32, i32
  }
}

</mosaic_0001>

<bundles_post_ra>
// kernel: tpu_custom_call.1
= control target key start
LH: loop header
LB: loop body
LE: loop exit
PB: predicated region body
PF: predicated region fallthrough
CT: control target
= control target key end

     0   :  { %s487_s0 = inlined_call_operand.hbm [shape: f32[3], index: 0, kind: input, shape index: {}]   ;;  %s488_s1 = inlined_call_operand.hbm [shape: f32[8,32], index: 1, kind: input, shape index: {}]   ;;  %s489_s2 = inlined_call_operand.hbm [shape: f32[8,32], index: 2, kind: input, shape index: {}]   ;;  %s490_s3 = inlined_call_operand.vmem [shape: f32[8,32], index: 3, kind: input, shape index: {}]   ;;  %s491_s4 = inlined_call_operand.hbm [shape: f32[8,32], index: 4, kind: input, shape index: {}]   ;;  %s492_s5 = inlined_call_operand.hbm [shape: f32[1,8,128], index: 5, kind: output, shape index: {}]  }
   0x1   :  { %s283_s20 = scalar_lea.hbm %s487_s0, 16 }
   0x2   :  { %p284_p0 = scmp.ne.s32.totalorder %s487_s0, %s283_s20  ;;  %p287_p1 = scmp.lt.u32.totalorder %s283_s20, %s487_s0 }
   0x4   :  { %p289_p2 = pnand %p287_p1, %p284_p0 }
   0x6   :  { %292 = shalt.err (!%p289_p2)  }
   0x7   :  { %s389_s25 = smov [#allocation4]  }
   0x8   :  { %11 = dma.hbm_to_smem %s487_s0, 16, %s389_s25, [#allocation3] }
   0x9   :  { %381 = dma.done.wait [#allocation3], 16 }
   0xa   :  { %382 = vsyncadd [#allocation3], 4294967280 }
   0xb   :  { %13 = sfence }
   0xc   :  { %14 = vsyncpa [#allocation6], 0 }
   0xd   :  { %15 = vsyncpa [#allocation9], 0 }
   0xe   :  { %16 = vsyncpa [#allocation7], 0  ;;  %s390_s28 = smov [#allocation8]   ;;  %s391_s30 = smov [#allocation5]  }
   0xf   :  { %s43_s29 = sshll.u32 %s390_s28, 4  ;;  %s28_s6 = sshll.u32 %s391_s30, 4  ;;  %s44_s29 = int_to_ptr.vmem [resolvable:$true] %s43_s29  ;;  %s29_s6 = int_to_ptr.vmem [resolvable:$true] %s28_s6 }
  0x10   :  { %s293_s9 = scalar_lea.hbm %s489_s2, 128 }
  0x11   :  { %p294_p3 = scmp.ne.s32.totalorder %s489_s2, %s293_s9  ;;  %p297_p4 = scmp.lt.u32.totalorder %s293_s9, %s489_s2 }
  0x13   :  { %p299_p5 = pnand %p297_p4, %p294_p3 }
  0x15   :  { %302 = shalt.err (!%p299_p5)
}
  0x16   :  { %s303_s13 = scalar_lea.vmem %s44_s29, 128  ;;  %p308_p7 = scmp.lt.s32.totalorder %s44_s29, %s44_s29 }
  0x17   :  { %p304_p6 = scmp.ne.s32.totalorder %s44_s29, %s303_s13  ;;  %p309_p8 = scmp.lt.s32.totalorder %s303_s13, %s303_s13 }
  0x19   :  { %p310_p9 = por %p309_p8, %p308_p7 }
  0x1b   :  { %p311_p10 = pnand %p310_p9, %p304_p6 }
  0x1d   :  { %314 = shalt.err (!%p311_p10)
}
  0x1e   :  { %46 = dma.hbm_to_vmem [thread:$0]  %s489_s2, 128, %s44_s29, [#allocation9]  }
  0x1f   :  { %s315_s18 = scalar_lea.hbm %s488_s1, 128 }
  0x20   :  { %p316_p11 = scmp.ne.s32.totalorder %s488_s1, %s315_s18  ;;  %p319_p12 = scmp.lt.u32.totalorder %s315_s18, %s488_s1 }
  0x22   :  { %p321_p13 = pnand %p319_p12, %p316_p11 }
  0x24   :  { %324 = shalt.err (!%p321_p13)
}
  0x25   :  { %s325_s23 = scalar_lea.vmem %s29_s6, 128  ;;  %p330_p1 = scmp.lt.s32.totalorder %s29_s6, %s29_s6 }
  0x26   :  { %p326_p0 = scmp.ne.s32.totalorder %s29_s6, %s325_s23  ;;  %p331_p2 = scmp.lt.s32.totalorder %s325_s23, %s325_s23 }
  0x28   :  { %p332_p3 = por %p331_p2, %p330_p1 }
  0x2a   :  { %p333_p4 = pnand %p332_p3, %p326_p0 }
  0x2c   :  { %336 = shalt.err (!%p333_p4)
}
  0x2d   :  { %31 = dma.hbm_to_vmem [thread:$0]  %s488_s1, 128, %s29_s6, [#allocation6]  }
  0x2e   :  { %s392_s25 = smov [#allocation10]   ;;  %s337_s29 = scalar_lea.hbm %s491_s4, 128 }
  0x2f   :  { %s70_s26 = sshll.u32 %s392_s25, 4  ;;  %p338_p5 = scmp.ne.s32.totalorder %s491_s4, %s337_s29  ;;  %s71_s26 = int_to_ptr.vmem [resolvable:$true] %s70_s26 }
  0x30   :  { %p341_p6 = scmp.lt.u32.totalorder %s337_s29, %s491_s4 }
  0x32   :  { %p343_p7 = pnand %p341_p6, %p338_p5 }
  0x34   :  { %346 = shalt.err (!%p343_p7)
}
  0x35   :  { %s347_s10 = scalar_lea.vmem %s71_s26, 128  ;;  %p352_p9 = scmp.lt.s32.totalorder %s71_s26, %s71_s26 }
  0x36   :  { %p348_p8 = scmp.ne.s32.totalorder %s71_s26, %s347_s10  ;;  %p353_p10 = scmp.lt.s32.totalorder %s347_s10, %s347_s10 }
  0x38   :  { %p354_p11 = por %p353_p10, %p352_p9 }
  0x3a   :  { %p355_p12 = pnand %p354_p11, %p348_p8 }
  0x3c   :  { %358 = shalt.err (!%p355_p12)
}
  0x3d   :  { %73 = dma.hbm_to_vmem [thread:$0]  %s491_s4, 128, %s71_s26, [#allocation9]  }
  0x3e   :  { %383 = dma.done.wait [#allocation6], 128  }
  0x3f   :  { %384 = vsyncadd [#allocation6], 4294967168 }
  0x40   :  { %385 = dma.done.wait [#allocation9], 256  }
  0x41   :  { %386 = vsyncadd [#allocation9], 4294967040  ;;  %v127_v0 = vld [vmem:[#allocation5] sm:$0xff]  ;;  %v157_v1 = vld [vmem:[#allocation10] sm:$0xff]  ;;  %vm132_vm0 = vcmask 261120   ;;  %s265_s4 = sld [smem:[#allocation4 + $0x2]] }
  0x42   :  { %v128_v2 = vld [vmem:[#allocation8] sm:$0xff]  ;;  %v158_v3 = vsub.f32 %v127_v0, %v157_v1  ;;  %v143_v5 = vld [vmem:[%s490_s3] sm:$0xff]  ;;  %s124_s3 = sld [smem:[#allocation4]]  ;;  %s264_s12 = sld [smem:[#allocation4 + $0x1]]  ;;  %vm190_vm7 = vcmask 7168  }
  0x43   :  { %v129_v4 = vsub.f32 %v127_v0, %v128_v2  ;;  %v144_v6 = vsub.f32 %v127_v0, %v143_v5  ;;  %s393_s14 = smov [#allocation11]  }
  0x44   :  { %v159_v7 = vadd.f32 1e-06, %v158_v3  ;;  %v119_v3 = vlaneseq  ;;  %s242_s15 = sshll.u32 %s393_s14, 4  ;;  %s243_s15 = int_to_ptr.vmem [resolvable:$true] %s242_s15 }
  0x45   :  { %v130_v8 = vadd.f32 1e-06, %v129_v4  ;;  %v145_v9 = vadd.f32 1e-06, %v144_v6  ;;  %s359_s17 = scalar_lea.vmem %s243_s15, 128  ;;  %p364_p0 = scmp.lt.s32.totalorder %s243_s15, %s243_s15 }
  0x46   :  { %v160_v10 = vmul.f32 %v159_v7, %v159_v7  ;;  %v120_v4 = vshrl.u32 %v119_v3, 7  ;;  %v223_v5 = vand.u32 127, %v119_v3  ;;  %p360_p13 = scmp.ne.s32.totalorder %s243_s15, %s359_s17  ;;  %p365_p1 = scmp.lt.s32.totalorder %s359_s17, %s359_s17 }
  0x47   :  { %v131_v11 = vmul.f32 %v130_v8, %v130_v8  ;;  %v146_v12 = vmul.f32 %v145_v9, %v145_v9  ;;  %v178_v31 = vstv %s265_s4 }
  0x48   :  { %v161_v13 = vsel %vm132_vm0, %v160_v10, 0.0  ;;  %v171_v28 = vstv %s124_s3  ;;  %v174_v34 = vstv %s264_s12  ;;  %vm224_vm8 = vcmp.eq.s32.totalorder %v120_v4, 0  ;;  %p366_p2 = por %p365_p1, %p364_p0 }
  0x49   :  { %v133_v14 = vsel %vm132_vm0, %v131_v11, 0.0  ;;  %162 = vadd.xlane.f32.xlu1 %v161_v13  ;;  %v147_v15 = vsel %vm132_vm0, %v146_v12, 0.0  ;;  %vm228_vm9 = vcmp.eq.s32.totalorder %v223_v5, 1  ;;  %vm225_vm10 = vcmp.eq.s32.totalorder %v223_v5, 0 }
  0x4a   :  { %134 = vadd.xlane.f32.xlu0 %v133_v14  ;;  %vm229_vm11 = vmand %vm224_vm8, %vm228_vm9  ;;  %p367_p3 = pnand %p366_p2, %p360_p13 }
  0x4b   :  { %vm226_vm12 = vmand %vm224_vm8, %vm225_vm10 }
  0x4e   :  { %148 = vadd.xlane.f32.xlu0 %v147_v15 }
  0xd6   :  { %v163_v16 = vpop.xlane.xlu1 %162 }
  0xd7   :  { %v135_v17 = vpop.xlane.xlu0 %134  ;;  %277 = vrsqrt.f32 %v163_v16  ;;  %vm166_vm1 = vcmp.eq.f32.partialorder %v163_v16, inf  ;;  %v169_v27 = vand.u32 2147483648, %v163_v16  ;;  %vm168_vm4 = vcmp.eq.f32.partialorder %v163_v16, 0.0 }
  0xd8   :  { %279 = vrsqrt.f32 %v135_v17  ;;  %vm138_vm2 = vcmp.eq.f32.partialorder %v135_v17, inf  ;;  %v141_v23 = vand.u32 2147483648, %v135_v17  ;;  %vm140_vm3 = vcmp.eq.f32.partialorder %v135_v17, 0.0 }
  0xdb   :  { %v149_v18 = vpop.xlane.xlu0 %148 }
  0xdc   :  { %281 = vrsqrt.f32 %v149_v18  ;;  %vm152_vm5 = vcmp.eq.f32.partialorder %v149_v18, inf  ;;  %v155_v32 = vand.u32 2147483648, %v149_v18  ;;  %vm154_vm6 = vcmp.eq.f32.partialorder %v149_v18, 0.0 }
  0xe1   :  { %v278_v19 = vpop.eup %277 }
  0xe2   :  { %v280_v20 = vpop.eup %279  ;;  %v165_v21 = vmul.f32 %v278_v19, %v163_v16 }
  0xe3   :  { %v137_v22 = vmul.f32 %v280_v20, %v135_v17 }
  0xe4   :  { %v167_v24 = vsel %vm166_vm1, %v163_v16, %v165_v21 }
  0xe5   :  { %v139_v26 = vsel %vm138_vm2, %v135_v17, %v137_v22  ;;  %v170_v33 = vsel %vm168_vm4, %v169_v27, %v167_v24 }
  0xe6   :  { %v282_v25 = vpop.eup %281  ;;  %v142_v30 = vsel %vm140_vm3, %v141_v23, %v139_v26  ;;  %v179_v41 = vsub.f32 %v178_v31, %v170_v33 }
  0xe7   :  { %v151_v29 = vmul.f32 %v282_v25, %v149_v18  ;;  %v172_v36 = vsub.f32 %v171_v28, %v142_v30 }
  0xe8   :  { %v180_v48 = vmul.f32 %v179_v41, %v179_v41 }
  0xe9   :  { %v153_v35 = vsel %vm152_vm5, %v149_v18, %v151_v29  ;;  %v173_v43 = vmul.f32 %v172_v36, %v172_v36 }
  0xea   :  { %v156_v37 = vsel %vm154_vm6, %v155_v32, %v153_v35 }
  0xeb   :  { %v182_v38 = vsub.f32 %v142_v30, %v156_v37  ;;  %v184_v39 = vsub.f32 %v156_v37, %v170_v33  ;;  %v175_v40 = vsub.f32 %v174_v34, %v156_v37 }
  0xed   :  { %v185_v42 = vadd.f32 3.0, %v184_v39  ;;  %v176_v44 = vmul.f32 %v175_v40, %v175_v40  ;;  %v183_v45 = vmax.f32 %v182_v38, 0.0 }
  0xef   :  { %v186_v46 = vmax.f32 %v185_v42, 0.0  ;;  %v177_v47 = vadd.f32 %v176_v44, %v173_v43 }
  0xf1   :  { %v187_v49 = vadd.f32 %v186_v46, %v183_v45  ;;  %v181_v50 = vadd.f32 %v180_v48, %v177_v47 }
  0xf3   :  { %v206_v51 = vsel %vm190_vm7, %v187_v49, 0.0  ;;  %v191_v52 = vsel %vm190_vm7, %v181_v50, 0.0 }
  0xf4   :  { %207 = vadd.xlane.f32.xlu0 %v206_v51  ;;  %192 = vadd.xlane.f32.xlu1 %v191_v52 }
 0x181   :  { %v208_v53 = vpop.xlane.xlu0 %207  ;;  %v193_v54 = vpop.xlane.xlu1 %192 }
 0x182   :  { %v209_v55 = vrot.slane %v208_v53, 4  ;;  %v194_v56 = vrot.slane %v193_v54, 4 }
 0x184   :  { %v210_v57 = vadd.f32 %v209_v55, %v208_v53  ;;  %v195_v58 = vadd.f32 %v194_v56, %v193_v54 }
 0x186   :  { %v211_v59 = vrot.slane %v210_v57, 2  ;;  %v196_v60 = vrot.slane %v195_v58, 2 }
 0x188   :  { %v212_v61 = vadd.f32 %v211_v59, %v210_v57  ;;  %v197_v62 = vadd.f32 %v196_v60, %v195_v58 }
 0x18a   :  { %v198_v63 = vrot.slane %v197_v62, 1  ;;  %v213_v0 = vrot.slane %v212_v61, 1 }
 0x18c   :  { %v199_v1 = vadd.f32 %v198_v63, %v197_v62  ;;  %v214_v2 = vadd.f32 %v213_v0, %v212_v61 }
 0x18e   :  { %268 = vpush %v199_v1 }
 0x18f   :  { %270 = vpush %v214_v2 }
 0x1bf   :  { %s269_s13 = spop %268 }
 0x1c0   :  { %v233_v6 = vstv %s269_s13  ;;  %s271_s16 = spop %270 }
 0x1c1   :  { %v231_v7 = vstv %s271_s16 }
 0x1c2   :  { %v232_v8 = vsel %vm229_vm11, %v231_v7, 0.0 }
 0x1c3   :  { %v234_v9 = vsel %vm226_vm12, %v233_v6, %v232_v8 }
 0x1c4   :  { %235 = vst [vmem:[#allocation11] sm:$0xff] %v234_v9 }
 0x1c5   :  { %370 = shalt.err (!%p367_p3)
}
 0x1c6   :  { %s371_s20 = scalar_lea.hbm %s492_s5, 128 }
 0x1c7   :  { %p372_p4 = scmp.ne.s32.totalorder %s492_s5, %s371_s20  ;;  %p375_p5 = scmp.lt.u32.totalorder %s371_s20, %s492_s5 }
 0x1c9   :  { %p377_p6 = pnand %p375_p5, %p372_p4 }
 0x1cb   :  { %380 = shalt.err (!%p377_p6)
}
 0x1cc   :  { %245 = dma.vmem_to_hbm [thread:$0]  %s243_s15, 128, %s492_s5, [#allocation7]  }
 0x1cd   :  { %387 = dma.done.wait [#allocation7], 128  }
 0x1ce   :  { %388 = vsyncadd [#allocation7], 4294967168 }
 0x1cf   :  { %249 = vsyncpa [#allocation6], 1 }
 0x1d0   :  { %250 = vsyncpa [#allocation9], 1 }
 0x1d1   :  { %251 = vsyncpa [#allocation7], 1 }

</bundles_post_ra>
